<compile_context>
chip_gen: v7x
topology: tpu7x:2x2x1
jax: 0.10.0
libtpu: 0.0.40
codegen_flags: <defaults>
</compile_context>

<pallas_src>
from math import ceil
import functools

import jax
import jax.numpy as jnp
import numpy as np
from jax.experimental import pallas as pl
from jax.experimental.pallas import tpu as pltpu


# ------------------------- pltpu.roll direction probe -------------------------

_ROLL_IS_JNP = [None]


def _roll_is_jnp_semantics():
    """True iff pltpu.roll(x, s)[..., j] == x[..., (j - s) % N] (jnp.roll semantics)."""
    if _ROLL_IS_JNP[0] is None:
        def probe(x_ref, o_ref):
            o_ref[...] = pltpu.roll(x_ref[...], shift=1, axis=1)

        with jax.ensure_compile_time_eval():
            x = jnp.arange(8 * 128, dtype=jnp.float32).reshape(8, 128)
            y = pl.pallas_call(
                probe, out_shape=jax.ShapeDtypeStruct((8, 128), jnp.float32))(x)
            _ROLL_IS_JNP[0] = bool(y[0, 1] == x[0, 0])
    return _ROLL_IS_JNP[0]


def _roll_arg(s, size, roll_jnp):
    """shift to pass to pltpu.roll so that result[..., j] == x[..., (j - s) % size]."""
    return (s % size) if roll_jnp else ((-s) % size)


# ----------------------- wrapper-side constant builders -----------------------

def _tap_mask(K, L, pad_l, bblk):
    """(K, bblk*L) 0/1 mask implementing zero-padding per batch segment for each tap."""
    S = bblk * L
    jmod = np.arange(S) % L
    m = np.ones((K, S), np.float32)
    for k in range(K):
        s = pad_l - k
        if s > 0:
            m[k] = (jmod >= s).astype(np.float32)
        elif s < 0:
            m[k] = (jmod < L + s).astype(np.float32)
    return m


def _tap_shift_mats(K, L, pad_l, bblk):
    """Block-diagonal (K, S, S) shifted identities (fallback for lane-unaligned S)."""
    S = bblk * L
    T = np.zeros((K, S, S), np.float32)
    j = np.arange(L)
    for k in range(K):
        off = k - pad_l
        i = j + off
        valid = (i >= 0) & (i < L)
        for b in range(bblk):
            T[k, b * L + i[valid], b * L + j[valid]] = 1.0
    return T


def _pool_select_roll(L, Lq, bblk):
    """(S_in, S_out) selection: out[:, b*Lq + q] = in[:, b*L + 4q] (after sliding max)."""
    sel = np.zeros((bblk * L, bblk * Lq), np.float32)
    q = np.arange(Lq)
    for b in range(bblk):
        sel[b * L + 4 * q, b * Lq + q] = 1.0
    return sel


def _pool_select_grouped(L, Lq, bblk):
    """Fallback pool selection: groups the 4 window taps into 4 contiguous lane blocks."""
    S_out = bblk * Lq
    sel = np.zeros((bblk * L, 4 * S_out), np.float32)
    q = np.arange(Lq)
    for b in range(bblk):
        for t in range(4):
            sel[b * L + 4 * q + t, t * S_out + b * Lq + q] = 1.0
    return sel


def _segment_mean_ones(L, bblk):
    """(bblk*L, bblk) per-segment ones matrix for the avg-pool head."""
    M = np.zeros((bblk * L, bblk), np.float32)
    for b in range(bblk):
        M[b * L:(b + 1) * L, b] = 1.0
    return M


# ------------------------------ in-kernel helpers ------------------------------

def _conv_roll(a, w_ref, m_ref, scale, bias, K, pad_l, relu, roll_jnp):
    """K-tap stride-1 'same' conv: lane rolls + mask, one bf16 MXU dot (S % 128 == 0)."""
    S = a.shape[-1]
    mask = m_ref[...]                                    # (K, S) f32 0/1
    taps = []
    for k in range(K):
        s = pad_l - k
        if s == 0:
            taps.append(a)
        else:
            r = pltpu.roll(a, shift=_roll_arg(s, S, roll_jnp), axis=1)
            taps.append(r * mask[k:k + 1, :])
    stk = jnp.concatenate(taps, axis=0) if K > 1 else taps[0]       # (K*Cin, S)
    y = jnp.dot(w_ref[...], stk.astype(jnp.bfloat16),
                preferred_element_type=jnp.float32)                 # (Cout, S)
    y = y * scale + bias
    return jnp.maximum(y, 0.0) if relu else y


def _conv_shiftmat(a, w_ref, t_ref, scale, bias, K, Cout, relu):
    """Fallback (lane width not a multiple of 128): per-tap bf16 shift-matrix dots."""
    taps = jnp.dot(w_ref[...], a.astype(jnp.bfloat16),
                   preferred_element_type=jnp.float32)              # (K*Cout, S)
    y = None
    for k in range(K):                                              # static unroll
        yk = jnp.dot(taps[k * Cout:(k + 1) * Cout, :].astype(jnp.bfloat16),
                     t_ref[k], preferred_element_type=jnp.float32)
        y = yk if y is None else y + yk
    y = y * scale + bias
    return jnp.maximum(y, 0.0) if relu else y


def _make_fused_kernel(plan, roll_jnp):
    """Build the whole-network kernel body from the static layer plan."""

    def kernel(*refs):
        o_ref = refs[-1]
        i = 0
        a = None
        for op in plan:
            kind = op["kind"]
            if kind == "conv_first":
                p_ref, w_ref, s_ref, b_ref = refs[i:i + 4]; i += 4
                z = jnp.dot(w_ref[...], p_ref[0],
                            preferred_element_type=jnp.float32)
                a = jnp.maximum(z * s_ref[...] + b_ref[...], 0.0)
            elif kind == "conv":
                w_ref, s_ref, b_ref, c_ref = refs[i:i + 4]; i += 4
                if op["roll"]:
                    a = _conv_roll(a, w_ref, c_ref, s_ref[...], b_ref[...],
                                   op["K"], op["pad_l"], True, roll_jnp)
                else:
                    a = _conv_shiftmat(a, w_ref, c_ref, s_ref[...], b_ref[...],
                                       op["K"], op["Cout"], True)
            elif kind == "res":
                w1, s1, b1, w2, s2, b2, c_ref = refs[i:i + 7]; i += 7
                if op["roll"]:
                    y = _conv_roll(a, w1, c_ref, s1[...], b1[...],
                                   op["K"], op["pad_l"], True, roll_jnp)
                    y = _conv_roll(y, w2, c_ref, s2[...], b2[...],
                                   op["K"], op["pad_l"], False, roll_jnp)
                else:
                    y = _conv_shiftmat(a, w1, c_ref, s1[...], b1[...],
                                       op["K"], op["Cout"], True)
                    y = _conv_shiftmat(y, w2, c_ref, s2[...], b2[...],
                                       op["K"], op["Cout"], False)
                if op["has_ds"]:
                    wd, sd, bd = refs[i:i + 3]; i += 3
                    res = (jnp.dot(wd[...], a.astype(jnp.bfloat16),
                                   preferred_element_type=jnp.float32)
                           * sd[...] + bd[...])
                else:
                    res = a
                a = jnp.maximum(y + res, 0.0)
            elif kind == "maxpool":
                sel_ref = refs[i]; i += 1
                if op["roll"]:
                    S = a.shape[-1]
                    b1 = jnp.maximum(
                        a, pltpu.roll(a, shift=_roll_arg(-1, S, roll_jnp), axis=1))
                    c2 = jnp.maximum(
                        b1, pltpu.roll(b1, shift=_roll_arg(-2, S, roll_jnp), axis=1))
                    a = jnp.dot(c2.astype(jnp.bfloat16), sel_ref[...],
                                preferred_element_type=jnp.float32)
                else:
                    So = op["S_out"]
                    g = jnp.dot(a.astype(jnp.bfloat16), sel_ref[...],
                                preferred_element_type=jnp.float32)
                    a = jnp.maximum(
                        jnp.maximum(g[:, 0:So], g[:, So:2 * So]),
                        jnp.maximum(g[:, 2 * So:3 * So], g[:, 3 * So:4 * So]))
            else:  # head: avg_pool1d(L) -> Linear -> softmax (per lane segment)
                m_ref, lw_ref, lb_ref = refs[i:i + 3]; i += 3
                m = jnp.dot(a.astype(jnp.bfloat16), m_ref[...],
                            preferred_element_type=jnp.float32) * (1.0 / op["Lf"])
                logits = (jnp.dot(lw_ref[...], m.astype(jnp.bfloat16),
                                  preferred_element_type=jnp.float32)
                          + lb_ref[...])                            # (nc, Bblk)
                z = logits - jnp.max(logits, axis=0, keepdims=True)
                e = jnp.exp(z)
                denom = jnp.sum(e, axis=0, keepdims=True)
                o_ref[0] = (e * pl.reciprocal(denom, approx=True)).astype(o_ref.dtype)

    return kernel


# --------------------------- input / plan builder -----------------------------

def _build_fused(x, layers, classifier, causal, bblk):
    B, C0, L0 = x.shape
    G = ceil(B / bblk)
    Bp = G * bblk
    if Bp != B:
        x = jnp.pad(x, ((0, Bp - B), (0, 0), (0, 0)))

    inputs, specs, plan = [], [], []

    def add_const(arr, dtype):
        arr = jnp.asarray(arr, dtype)
        specs.append(pl.BlockSpec(arr.shape, lambda g, _n=arr.ndim: (0,) * _n))
        inputs.append(arr)

    def add_conv_consts(p, K, Cin, Cout, use_roll):
        w = p["w"]                                              # (Cout, Cin, K)
        if use_roll:
            # taps folded into the contraction: column k*Cin + ci == w[:, ci, k]
            add_const(jnp.transpose(w, (0, 2, 1)).reshape(Cout, K * Cin), jnp.bfloat16)
        else:
            # tap-stacked rows for the fallback path
            add_const(jnp.transpose(w, (2, 0, 1)).reshape(K * Cout, Cin), jnp.bfloat16)
        add_const(p["scale"].reshape(Cout, 1), jnp.float32)
        add_const(p["bias"].reshape(Cout, 1), jnp.float32)

    assert layers and layers[0][0] == "basic", "first layer must be a BasicBlock"

    cur_C, cur_L, first = C0, L0, True
    for layer in layers:
        kind = layer[0]
        if kind == "basic":
            _, p, K, s = layer
            Cout = p["w"].shape[0]
            out_len = ceil(cur_L / s)
            pad = max(0, (out_len - 1) * s + K - cur_L)
            pad_l, pad_r = (pad, 0) if causal else (pad // 2, pad - pad // 2)
            if first:
                # Wrapper-side im2col -> single in-kernel MXU dot.  This bf16 patch
                # tile is the only per-grid-step (pipelined) input.
                # TODO(synk): for very long inputs, build patches in-kernel from the
                # raw waveform to avoid the ~K/stride HBM inflation.
                xp = jnp.pad(x, ((0, 0), (0, 0), (pad_l, pad_r)))
                gather = np.arange(K)[:, None] + s * np.arange(out_len)[None, :]
                pt = xp[:, :, gather]                           # (Bp, Cin, K, Lout)
                pt = jnp.transpose(pt, (0, 2, 1, 3)).reshape(Bp, K * cur_C, out_len)
                pt = (pt.reshape(G, bblk, K * cur_C, out_len)
                        .transpose(0, 2, 1, 3)
                        .reshape(G, K * cur_C, bblk * out_len))
                inputs.append(pt.astype(jnp.bfloat16))
                specs.append(pl.BlockSpec((1, K * cur_C, bblk * out_len),
                                          lambda g: (g, 0, 0)))
                add_const(jnp.transpose(p["w"], (0, 2, 1)).reshape(Cout, K * cur_C),
                          jnp.bfloat16)
                add_const(p["scale"].reshape(Cout, 1), jnp.float32)
                add_const(p["bias"].reshape(Cout, 1), jnp.float32)
                plan.append({"kind": "conv_first"})
                first = False
            else:
                assert s == 1, "Mn uses stride 1 after the first layer"
                use_roll = (bblk * cur_L) % 128 == 0
                add_conv_consts(p, K, cur_C, Cout, use_roll)
                if use_roll:
                    add_const(_tap_mask(K, cur_L, pad_l, bblk), jnp.float32)
                else:
                    add_const(_tap_shift_mats(K, cur_L, pad_l, bblk), jnp.bfloat16)
                plan.append({"kind": "conv", "K": K, "Cout": Cout,
                             "pad_l": pad_l, "roll": use_roll})
                out_len = cur_L
            cur_C, cur_L = Cout, out_len
        elif kind == "maxpool":
            Lq = cur_L // 4
            use_roll = (bblk * cur_L) % 128 == 0
            if use_roll:
                add_const(_pool_select_roll(cur_L, Lq, bblk), jnp.bfloat16)
            else:
                add_const(_pool_select_grouped(cur_L, Lq, bblk), jnp.bfloat16)
            plan.append({"kind": "maxpool", "roll": use_roll, "S_out": bblk * Lq})
            cur_L = Lq
        else:  # "res"
            _, p1, p2, ds, K, s = layer
            assert s == 1, "Mn uses stride 1 after the first layer"
            Cout = p1["w"].shape[0]
            pad = K - 1
            pad_l = pad if causal else pad // 2
            use_roll = (bblk * cur_L) % 128 == 0
            add_conv_consts(p1, K, cur_C, Cout, use_roll)
            add_conv_consts(p2, K, Cout, Cout, use_roll)
            if use_roll:
                add_const(_tap_mask(K, cur_L, pad_l, bblk), jnp.float32)
            else:
                add_const(_tap_shift_mats(K, cur_L, pad_l, bblk), jnp.bfloat16)
            has_ds = ds is not None
            if has_ds:
                add_const(ds["w"].reshape(Cout, cur_C), jnp.bfloat16)   # 1x1 downsample
                add_const(ds["scale"].reshape(Cout, 1), jnp.float32)
                add_const(ds["bias"].reshape(Cout, 1), jnp.float32)
            plan.append({"kind": "res", "K": K, "Cout": Cout, "pad_l": pad_l,
                         "roll": use_roll, "has_ds": has_ds})
            cur_C = Cout

    lin_w, lin_b = classifier
    add_const(_segment_mean_ones(cur_L, bblk), jnp.bfloat16)
    add_const(lin_w, jnp.bfloat16)                              # (nc, C_final)
    add_const(lin_b.reshape(-1, 1), jnp.float32)                # (nc, 1)
    plan.append({"kind": "head", "Lf": cur_L})
    return inputs, specs, plan, G


def mn_forward(x, layers, classifier, causal=True, batch_block=None):
    """Whole Mn forward pass in a single pallas_call (grid over batch groups)."""
    B = x.shape[0]
    nc = classifier[0].shape[0]
    if batch_block is None:
        l1 = ceil(x.shape[-1] / 4)
        batch_block = int(max(1, min(B, max(1, 512 // max(1, l1)))))
    bblk = int(batch_block)

    roll_jnp = _roll_is_jnp_semantics()
    inputs, in_specs, plan, G = _build_fused(x, layers, classifier, causal, bblk)

    # explicit VMEM budget (grid-invariant constants + double-buffered patch tile)
    const_bytes = sum(int(a.size) * a.dtype.itemsize for a in inputs[1:])
    step_bytes = int(np.prod(inputs[0].shape[1:])) * inputs[0].dtype.itemsize
    vmem_limit = int(min(64 * 2 ** 20,
                         max(32 * 2 ** 20, 4 * (const_bytes + 2 * step_bytes))))

    out = pl.pallas_call(
        _make_fused_kernel(plan, roll_jnp),
        out_shape=jax.ShapeDtypeStruct((G, nc, bblk), jnp.float32),
        grid=(G,),
        in_specs=in_specs,
        out_specs=pl.BlockSpec((1, nc, bblk), lambda g: (g, 0, 0)),
        compiler_params=pltpu.CompilerParams(
            dimension_semantics=("parallel",),
            vmem_limit_bytes=vmem_limit),
    )(*inputs)
    out = jnp.transpose(out, (0, 2, 1)).reshape(G * bblk, nc)[:B]
    return out.reshape(B, 1, nc)


# --------------------------- parameter construction ---------------------------

def init_conv_bn(key, cin, cout, K, eps=1e-5):
    k1, k2, k3, k4, k5, k6 = jax.random.split(key, 6)
    w = jax.random.normal(k1, (cout, cin, K), jnp.float32) / np.sqrt(cin * K)
    b = 0.01 * jax.random.normal(k2, (cout,), jnp.float32)
    gamma = 1.0 + 0.1 * jax.random.normal(k3, (cout,), jnp.float32)
    beta = 0.1 * jax.random.normal(k4, (cout,), jnp.float32)
    running_mean = 0.1 * jax.random.normal(k5, (cout,), jnp.float32)
    running_var = 1.0 + 0.1 * jax.random.uniform(k6, (cout,), jnp.float32)
    scale = gamma / jnp.sqrt(running_var + eps)
    bias = beta + (b - running_mean) * scale
    return {"w": w, "scale": scale, "bias": bias}


def init_mn_params(key, cfg, num_classes=2, residual=False):
    layers = []
    in_ch = 1
    kernel_size, stride = 80, 4
    for i, l in enumerate(cfg):
        if i == 0:
            key, sub = jax.random.split(key)
            layers.append(("basic", init_conv_bn(sub, in_ch, l, 80), 80, 4))
            kernel_size, stride = 3, 1
            in_ch = l
        elif l == 'M':
            layers.append(("maxpool",))
        else:
            if residual:
                key, s1, s2, s3 = jax.random.split(key, 4)
                p1 = init_conv_bn(s1, in_ch, l, kernel_size)
                p2 = init_conv_bn(s2, l, l, kernel_size)
                ds = (init_conv_bn(s3, in_ch, l, 1)
                      if (stride != 1 or in_ch != l) else None)
                layers.append(("res", p1, p2, ds, kernel_size, stride))
            else:
                key, sub = jax.random.split(key)
                layers.append(("basic", init_conv_bn(sub, in_ch, l, kernel_size),
                               kernel_size, stride))
            in_ch = l
    in_features = cfg[-2] if isinstance(cfg[-1], str) else cfg[-1]
    key, kw, kb = jax.random.split(key, 3)
    lin_w = jax.random.normal(kw, (num_classes, in_features),
                              jnp.float32) / np.sqrt(in_features)
    lin_b = 0.01 * jax.random.normal(kb, (num_classes,), jnp.float32)
    return layers, (lin_w, lin_b)


# --------------------------- pure-JAX reference (f32) --------------------------

def mn_reference(x, layers, classifier, causal=True):
    def same_pad(a, k, s):
        L = a.shape[-1]
        out_len = ceil(L / s)
        pad = max(0, (out_len - 1) * s + k - L)
        lo, hi = (pad, 0) if causal else (pad // 2, pad - pad // 2)
        return jnp.pad(a, ((0, 0), (0, 0), (lo, hi)))

    def conv_bn(a, p, k, s, relu):
        ap = same_pad(a, k, s)
        y = jax.lax.conv_general_dilated(
            ap, p["w"], window_strides=(s,), padding="VALID",
            dimension_numbers=("NCH", "OIH", "NCH"))
        y = y * p["scale"][None, :, None] + p["bias"][None, :, None]
        return jnp.maximum(y, 0.0) if relu else y

    a = x
    for layer in layers:
        if layer[0] == "basic":
            _, p, k, s = layer
            a = conv_bn(a, p, k, s, True)
        elif layer[0] == "maxpool":
            Bn, Cn, Ln = a.shape
            Lq = Ln // 4
            a = a[:, :, :4 * Lq].reshape(Bn, Cn, Lq, 4).max(axis=-1)
        else:
            _, p1, p2, ds, k, s = layer
            y = conv_bn(a, p1, k, s, True)
            y = conv_bn(y, p2, k, s, False)
            r = conv_bn(a, ds, 1, s, False) if ds is not None else a
            a = jnp.maximum(y + r, 0.0)
    lw, lb = classifier
    m = jnp.mean(a, axis=-1)
    logits = m @ lw.T + lb[None, :]
    return jax.nn.softmax(logits, axis=-1)[:, None, :]


# ----------------------------------- main --------------------------------------

if __name__ == "__main__":
    _roll_is_jnp_semantics()        # determine pltpu.roll direction once, eagerly

    key = jax.random.PRNGKey(0)
    kparams, kdata = jax.random.split(key)
    num_classes = 2
    cfg = [8, 'M', 16]              # BasicBlock(1->8, K=80, s=4), MaxPool(4), block(8->16)

    def run_config(L0, residual, seed):
        kp = jax.random.fold_in(kparams, seed)
        kx = jax.random.fold_in(kdata, seed)
        layers, classifier = init_mn_params(kp, cfg, num_classes=num_classes,
                                            residual=residual)
        B = 2
        x = jax.random.normal(kx, (B, 1, L0), jnp.float32)
        ref = np.asarray(mn_reference(x, layers, classifier, causal=True))
        outs = []
        for bblk in (1, 2):         # per-sample grid and lane-stacked batch block
            fwd = jax.jit(functools.partial(mn_forward, layers=layers,
                                            classifier=classifier, causal=True,
                                            batch_block=bblk))
            o = np.asarray(jax.block_until_ready(fwd(x)))
            assert o.shape == (B, 1, num_classes), o.shape
            assert np.all(np.isfinite(o))
            assert np.allclose(o.sum(-1), 1.0, atol=5e-3)
            err = float(np.abs(o - ref).max())
            assert err < 5e-2, f"kernel vs reference mismatch: {err}"
            outs.append(o)
        assert float(np.abs(outs[0] - outs[1]).max()) < 2e-2
        return outs

    # BasicBlock stack: exercises roll-path convs (bblk=2), the lane-unaligned
    # shift-matrix fallback (bblk=1) and the roll-path maxpool.
    run_config(L0=1024, residual=False, seed=0)
    # ResBlock + 1x1 downsample: also exercises the maxpool fallback (bblk=1).
    run_config(L0=768, residual=True, seed=1)

    print("KERNEL_OK")
</pallas_src>

<mosaic_0001>
module attributes {stable_mosaic.version = 11 : i64} {
  func.func @probe(%arg0: memref<8x128xf32, #tpu.memory_space<vmem>>, %arg1: memref<8x128xf32, #tpu.memory_space<vmem>>) attributes {dimension_semantics = [], scalar_prefetch = 0 : i64, scratch_operands = 0 : i64, tpu.core_type = #tpu.core_type<tc>} {
    %c0 = arith.constant 0 : index
    %c0_0 = arith.constant 0 : index
    %0 = vector.load %arg0[%c0, %c0_0] : memref<8x128xf32, #tpu.memory_space<vmem>>, vector<8x128xf32>
    %c1_i32 = arith.constant 1 : i32
    %1 = tpu.dynamic_rotate %0 by %c1_i32 dim 1 : vector<8x128xf32>, i32 -> vector<8x128xf32>
    %c0_1 = arith.constant 0 : index
    %c0_2 = arith.constant 0 : index
    %2 = vector.load %arg1[%c0_1, %c0_2] : memref<8x128xf32, #tpu.memory_space<vmem>>, vector<8x128xf32>
    tpu.vector_store %arg1[%c0_1, %c0_2], %1 {strides = array<i32>} : memref<8x128xf32, #tpu.memory_space<vmem>>, vector<8x128xf32>,
    return
  }
}

</mosaic_0001>

<bundles_post_ra>
// kernel: tpu_custom_call.1
= control target key start
LH: loop header
LB: loop body
LE: loop exit
PB: predicated region body
PF: predicated region fallthrough
CT: control target
= control target key end

     0   :  { %6 = vsyncpa [#allocation3], 0  ;;  %s128_s0 = inlined_call_operand.hbm [shape: f32[8,128], index: 0, kind: input, shape index: {}]   ;;  %s129_s1 = inlined_call_operand.hbm [shape: f32[8,128], index: 1, kind: output, shape index: {}]  }
   0x1   :  { %7 = vsyncpa [#allocation4], 0  ;;  %s91_s6 = smov [#allocation2]   ;;  %s43_s10 = scalar_lea.hbm %s128_s0, 128 }
   0x2   :  { %s14_s7 = sshll.u32 %s91_s6, 4  ;;  %p44_p0 = scmp.ne.s32.totalorder %s128_s0, %s43_s10  ;;  %s15_s7 = int_to_ptr.vmem [resolvable:$true] %s14_s7 }
   0x3   :  { %p47_p1 = scmp.lt.u32.totalorder %s43_s10, %s128_s0 }
   0x5   :  { %p49_p2 = pnand %p47_p1, %p44_p0 }
   0x7   :  { %52 = shalt.err (!%p49_p2)
}
   0x8   :  { %s53_s15 = scalar_lea.vmem %s15_s7, 128  ;;  %p58_p4 = scmp.lt.s32.totalorder %s15_s7, %s15_s7 }
   0x9   :  { %p54_p3 = scmp.ne.s32.totalorder %s15_s7, %s53_s15  ;;  %p59_p5 = scmp.lt.s32.totalorder %s53_s15, %s53_s15 }
   0xb   :  { %p60_p6 = por %p59_p5, %p58_p4 }
   0xd   :  { %p61_p7 = pnand %p60_p6, %p54_p3 }
   0xf   :  { %64 = shalt.err (!%p61_p7)
}
  0x10   :  { %17 = dma.hbm_to_vmem [thread:$0]  %s128_s0, 128, %s15_s7, [#allocation3]  }
  0x11   :  { %87 = dma.done.wait [#allocation3], 128  }
  0x12   :  { %88 = vsyncadd [#allocation3], 4294967168  ;;  %v21_v0 = vld [vmem:[#allocation2] sm:$0xff]  ;;  %s92_s18 = smov 1   ;;  %s93_s19 = smov [#allocation5]  }
  0x13   :  { %22 = vrot.lane.b32.xlu0 %v21_v0, %s92_s18  ;;  %s31_s20 = sshll.u32 %s93_s19, 4  ;;  %s32_s20 = int_to_ptr.vmem [resolvable:$true] %s31_s20 }
  0x14   :  { %s65_s21 = scalar_lea.vmem %s32_s20, 128  ;;  %p70_p9 = scmp.lt.s32.totalorder %s32_s20, %s32_s20 }
  0x15   :  { %p66_p8 = scmp.ne.s32.totalorder %s32_s20, %s65_s21  ;;  %p71_p10 = scmp.lt.s32.totalorder %s65_s21, %s65_s21 }
  0x17   :  { %p72_p11 = por %p71_p10, %p70_p9 }
  0x19   :  { %p73_p12 = pnand %p72_p11, %p66_p8 }
  0x85   :  { %v23_v1 = vpop.permute.xlu0 %22 }
  0x86   :  { %24 = vst [vmem:[#allocation5] sm:$0xff] %v23_v1 }
  0x87   :  { %76 = shalt.err (!%p73_p12)
}
  0x88   :  { %s77_s0 = scalar_lea.hbm %s129_s1, 128 }
  0x89   :  { %p78_p13 = scmp.ne.s32.totalorder %s129_s1, %s77_s0  ;;  %p81_p0 = scmp.lt.u32.totalorder %s77_s0, %s129_s1 }
  0x8b   :  { %p83_p1 = pnand %p81_p0, %p78_p13 }
  0x8d   :  { %86 = shalt.err (!%p83_p1)
}
  0x8e   :  { %34 = dma.vmem_to_hbm [thread:$0]  %s32_s20, 128, %s129_s1, [#allocation4]  }
  0x8f   :  { %89 = dma.done.wait [#allocation4], 128  }
  0x90   :  { %90 = vsyncadd [#allocation4], 4294967168 }
  0x91   :  { %38 = vsyncpa [#allocation3], 1 }
  0x92   :  { %39 = vsyncpa [#allocation4], 1 }

</bundles_post_ra>
